<compile_context>
chip_gen: v5e
topology: v5e:2x2
jax: 0.10.0
libtpu: 0.0.40
codegen_flags: <defaults>
</compile_context>

<pallas_src>
import jax
import jax.numpy as jnp
from jax.experimental import pallas as pl
from jax.experimental.pallas import tpu as pltpu


def _head_kernel(out_e_ref, patch_ref, w_key_ref, w_out_k_ref, out_ref):
    # out_e_ref   : (B, k_out)    precomputed relu(emb @ W_emb) @ W_out[:mid]
    # patch_ref   : (TP, k_in)    current P-tile of the patch matrix
    # w_key_ref   : (k_in, mid)   proj_key weight, stored (in, out)
    # w_out_k_ref : (mid, k_out)  bottom half of net[-1] weight, (in, out)
    # out_ref     : (B, TP, k_out)
    #
    # relu(cat([e, k])) @ W_out == relu(e) @ W_out[:mid] + relu(k) @ W_out[mid:]
    # (exact split; the first term is the precomputed per-batch out_e).
    k = jnp.dot(patch_ref[...], w_key_ref[...],
                preferred_element_type=jnp.float32)              # (TP, mid)
    k_act = jnp.maximum(k, 0.0)
    out_k = jnp.dot(k_act, w_out_k_ref[...],
                    preferred_element_type=jnp.float32)          # (TP, k_out)
    out_e = out_e_ref[...]                                       # (B, k_out)
    out_ref[...] = (out_e[:, None, :] + out_k[None, :, :]).astype(out_ref.dtype)


def _pick_p_tile(P, max_tile=1024):
    """Largest P tile <= max_tile that evenly divides P (multiple of 8 if tiled)."""
    if P <= max_tile:
        return P
    start = max_tile - (max_tile % 8)
    for t in range(start, 7, -8):
        if P % t == 0:
            return t
    return P  # fallback: single tile over the whole P axis


def head_forward(x, emb, w_emb, w_key, w_out, p_sz, *, max_p_tile=1024):
    """Pallas forward pass matching Head.forward (eval mode).

    x     : (1, 3, H, W)       NCHW (single image, expanded over the batch)
    emb   : (B, 1, emb_sz)
    w_emb : (emb_sz, mid)   w_key : (3*p*p, mid)   w_out : (2*mid, 3*p*p)
            (all stored (in, out) == PyTorch weight .T)
    returns (B, 3, H, W)
    """
    bx, c, H, W = x.shape
    assert c == 3
    assert bx == 1, "patch branch is expanded over the batch (torch .expand)"
    u, v = H // p_sz, W // p_sz
    P = u * v
    k_in = c * p_sz * p_sz
    B, one, emb_sz = emb.shape
    assert one == 1
    mid = w_emb.shape[1]
    k_out = w_out.shape[1]

    # rearrange 'c (u m) (v n) -> (u v) (c m n)'   (pure-JAX glue, bx == 1)
    patches = x.reshape(c, u, p_sz, v, p_sz)
    patches = patches.transpose(1, 3, 0, 2, 4).reshape(P, k_in)

    # Batched embedding path (tiny: B rows) done once in the wrapper.
    emb2 = emb.reshape(B, emb_sz)
    out_e = jnp.maximum(emb2 @ w_emb, 0.0) @ w_out[:mid]         # (B, k_out)
    w_out_k = w_out[mid:]                                        # (mid, k_out)

    TP = _pick_p_tile(P, max_p_tile)
    grid = (P // TP,)

    y = pl.pallas_call(
        _head_kernel,
        out_shape=jax.ShapeDtypeStruct((B, P, k_out), x.dtype),
        grid_spec=pltpu.PrefetchScalarGridSpec(
            num_scalar_prefetch=0,
            grid=grid,
            in_specs=[
                pl.BlockSpec((B, k_out), lambda p: (0, 0)),      # out_e (resident)
                pl.BlockSpec((TP, k_in), lambda p: (p, 0)),      # patch tile
                pl.BlockSpec((k_in, mid), lambda p: (0, 0)),     # w_key (resident)
                pl.BlockSpec((mid, k_out), lambda p: (0, 0)),    # w_out[mid:]
            ],
            out_specs=pl.BlockSpec((B, TP, k_out), lambda p: (0, p, 0)),
        ),
        compiler_params=pltpu.CompilerParams(
            dimension_semantics=("parallel",)),
    )(out_e, patches, w_key, w_out_k)

    # rearrange 'b (u v) (c m n) -> b c (u m) (v n)'
    out = y.reshape(B, u, v, c, p_sz, p_sz)
    return out.transpose(0, 3, 1, 4, 2, 5).reshape(B, c, u * p_sz, v * p_sz)


def _reference(x, emb, w_emb, w_key, w_out, p_sz):
    """Pure-JAX reference (eval mode) for correctness checking."""
    bx, c, H, W = x.shape
    u, v = H // p_sz, W // p_sz
    P = u * v
    k_in = c * p_sz * p_sz
    B = emb.shape[0]
    patches = x.reshape(bx, c, u, p_sz, v, p_sz)
    patches = patches.transpose(0, 2, 4, 1, 3, 5).reshape(bx, P, k_in)
    e = emb @ w_emb                                     # (B, 1, mid)
    k = patches @ w_key                                 # (bx, P, mid)
    e = jnp.broadcast_to(e, (B, P, e.shape[-1]))
    k = jnp.broadcast_to(k, (B, P, k.shape[-1]))
    z = jnp.maximum(jnp.concatenate([e, k], axis=-1), 0.0)
    y = z @ w_out                                       # (B, P, k_out)
    out = y.reshape(B, u, v, c, p_sz, p_sz)
    return out.transpose(0, 3, 1, 4, 2, 5).reshape(B, c, u * p_sz, v * p_sz)


if __name__ == "__main__":
    # Small shapes consistent with the module.
    p_sz, emb_sz, mid_sz = 4, 32, 64
    H = W = 16
    B = 2
    k_in = 3 * p_sz * p_sz          # 48
    k_out = 3 * p_sz * p_sz         # 48

    key = jax.random.PRNGKey(0)
    kx, ke, k1, k2, k3 = jax.random.split(key, 5)

    x = jax.random.normal(kx, (1, 3, H, W), dtype=jnp.float32)
    emb = jax.random.normal(ke, (B, 1, emb_sz), dtype=jnp.float32)

    # Deterministic weight init (uniform +/- 1/sqrt(fan_in), like nn.Linear),
    # stored (in, out) so the kernel does x @ W.
    def init(k, fan_in, fan_out):
        bound = 1.0 / (fan_in ** 0.5)
        return jax.random.uniform(k, (fan_in, fan_out), jnp.float32,
                                  minval=-bound, maxval=bound)

    w_emb = init(k1, emb_sz, mid_sz)          # proj_emb.weight.T
    w_key = init(k2, k_in, mid_sz)            # proj_key.weight.T
    w_out = init(k3, 2 * mid_sz, k_out)       # net[-1].weight.T

    out = head_forward(x, emb, w_emb, w_key, w_out, p_sz)
    out = jax.block_until_ready(out)

    ref = _reference(x, emb, w_emb, w_key, w_out, p_sz)
    assert out.shape == (B, 3, H, W)
    assert jnp.allclose(out, ref, atol=1e-4, rtol=1e-4), "mismatch vs reference"

    print("KERNEL_OK")
</pallas_src>

<mosaic_0001>
module attributes {stable_mosaic.version = 11 : i64} {
  func.func @_head_kernel(%arg0: i32, %arg1: memref<2x48xf32, #tpu.memory_space<vmem>>, %arg2: memref<16x48xf32, #tpu.memory_space<vmem>>, %arg3: memref<48x64xf32, #tpu.memory_space<vmem>>, %arg4: memref<64x48xf32, #tpu.memory_space<vmem>>, %arg5: memref<2x16x48xf32, #tpu.memory_space<vmem>>) attributes {dimension_semantics = [#tpu.dimension_semantics<parallel>], iteration_bounds = array<i64: 1>, scalar_prefetch = 0 : i64, scratch_operands = 0 : i64, tpu.core_type = #tpu.core_type<tc>, window_params = [{pipeline_mode = #tpu.pipeline_mode<synchronous>, transform_indices = @transform_0, window_bounds = array<i64: 2, 48>}, {transform_indices = @transform_1, window_bounds = array<i64: 16, 48>}, {pipeline_mode = #tpu.pipeline_mode<synchronous>, transform_indices = @transform_2, window_bounds = array<i64: 48, 64>}, {pipeline_mode = #tpu.pipeline_mode<synchronous>, transform_indices = @transform_3, window_bounds = array<i64: 64, 48>}, {transform_indices = @transform_4, window_bounds = array<i64: 2, 16, 48>}]} {
    %c0 = arith.constant 0 : index
    %c0_0 = arith.constant 0 : index
    %0 = vector.load %arg2[%c0, %c0_0] : memref<16x48xf32, #tpu.memory_space<vmem>>, vector<16x48xf32>
    %c0_1 = arith.constant 0 : index
    %c0_2 = arith.constant 0 : index
    %1 = vector.load %arg3[%c0_1, %c0_2] : memref<48x64xf32, #tpu.memory_space<vmem>>, vector<48x64xf32>
    %cst = arith.constant dense<0.000000e+00> : vector<16x64xf32>
    %2 = tpu.matmul %0, %1, %cst {dimension_numbers = #tpu.dot_dimension_numbers<[1], [0], [0], [1], [0, 0, 1, 1], [], []>} : vector<16x48xf32>, vector<48x64xf32>, vector<16x64xf32> -> vector<16x64xf32>
    %cst_3 = arith.constant 0.000000e+00 : f32
    %3 = vector.broadcast %cst_3 : f32 to vector<16x64xf32>
    %4 = arith.maximumf %2, %3 : vector<16x64xf32>
    %c0_4 = arith.constant 0 : index
    %c0_5 = arith.constant 0 : index
    %5 = vector.load %arg4[%c0_4, %c0_5] : memref<64x48xf32, #tpu.memory_space<vmem>>, vector<64x48xf32>
    %cst_6 = arith.constant dense<0.000000e+00> : vector<16x48xf32>
    %6 = tpu.matmul %4, %5, %cst_6 {dimension_numbers = #tpu.dot_dimension_numbers<[1], [0], [0], [1], [0, 0, 1, 1], [], []>} : vector<16x64xf32>, vector<64x48xf32>, vector<16x48xf32> -> vector<16x48xf32>
    %c0_7 = arith.constant 0 : index
    %c0_8 = arith.constant 0 : index
    %7 = vector.load %arg1[%c0_7, %c0_8] : memref<2x48xf32, #tpu.memory_space<vmem>>, vector<2x48xf32>
    %8 = vector.shape_cast %7 : vector<2x48xf32> to vector<2x1x48xf32>
    %9 = vector.shape_cast %6 : vector<16x48xf32> to vector<1x16x48xf32>
    %10 = vector.broadcast %8 : vector<2x1x48xf32> to vector<2x16x48xf32>
    %11 = vector.broadcast %9 : vector<1x16x48xf32> to vector<2x16x48xf32>
    %12 = arith.addf %10, %11 : vector<2x16x48xf32>
    %c0_9 = arith.constant 0 : index
    %c0_10 = arith.constant 0 : index
    %c0_11 = arith.constant 0 : index
    %13 = vector.load %arg5[%c0_9, %c0_10, %c0_11] : memref<2x16x48xf32, #tpu.memory_space<vmem>>, vector<2x16x48xf32>
    tpu.vector_store %arg5[%c0_9, %c0_10, %c0_11], %12 {strides = array<i32>} : memref<2x16x48xf32, #tpu.memory_space<vmem>>, vector<2x16x48xf32>,
    return
  }
  func.func @transform_0(%arg0: i32) -> (i32, i32) {
    %c0_i32 = arith.constant 0 : i32
    %c0_i32_0 = arith.constant 0 : i32
    %c0_i32_1 = arith.constant 0 : i32
    return %c0_i32, %c0_i32_0 : i32, i32
  }
  func.func @transform_1(%arg0: i32) -> (i32, i32) {
    %c0_i32 = arith.constant 0 : i32
    %c0_i32_0 = arith.constant 0 : i32
    return %arg0, %c0_i32 : i32, i32
  }
  func.func @transform_2(%arg0: i32) -> (i32, i32) {
    %c0_i32 = arith.constant 0 : i32
    %c0_i32_0 = arith.constant 0 : i32
    %c0_i32_1 = arith.constant 0 : i32
    return %c0_i32, %c0_i32_0 : i32, i32
  }
  func.func @transform_3(%arg0: i32) -> (i32, i32) {
    %c0_i32 = arith.constant 0 : i32
    %c0_i32_0 = arith.constant 0 : i32
    %c0_i32_1 = arith.constant 0 : i32
    return %c0_i32, %c0_i32_0 : i32, i32
  }
  func.func @transform_4(%arg0: i32) -> (i32, i32, i32) {
    %c0_i32 = arith.constant 0 : i32
    %c0_i32_0 = arith.constant 0 : i32
    %c0_i32_1 = arith.constant 0 : i32
    return %c0_i32, %arg0, %c0_i32_0 : i32, i32, i32
  }
}

</mosaic_0001>

<bundles_post_ra>
// kernel: tpu_custom_call.1
= control target key start
LH: loop header
LB: loop body
LE: loop exit
PB: predicated region body
PF: predicated region fallthrough
CT: control target
= control target key end

     0   :  { %s264_s0 = inlined_call_operand.vmem [shape: f32[2,48], index: 0, kind: input, shape index: {}]   ;;  %s265_s1 = inlined_call_operand.vmem [shape: f32[16,48], index: 1, kind: input, shape index: {}]   ;;  %s266_s2 = inlined_call_operand.vmem [shape: f32[48,64], index: 2, kind: input, shape index: {}]   ;;  %s267_s3 = inlined_call_operand.vmem [shape: f32[64,48], index: 3, kind: input, shape index: {}]   ;;  %s268_s4 = inlined_call_operand.hbm [shape: f32[2,16,48], index: 4, kind: output, shape index: {}]  }
   0x1   :  { %v25_v0 = vld [vmem:[%s266_s2 + $0x28] sm:$0xff]  ;;  %v24_v1 = vld [vmem:[%s266_s2 + $0x20] sm:$0xff]  ;;  %v23_v2 = vld [vmem:[%s266_s2 + $0x18] sm:$0xff] }
   0x2   :  { %133 = vmatpush.msra.mxu3 %v25_v0  ;;  %43 = vmatpush.msra.mxu0 %v25_v0  ;;  %v65_v3 = vld [vmem:[%s267_s3 + $0x38] sm:$0xff]  ;;  %v64_v4 = vld [vmem:[%s267_s3 + $0x30] sm:$0xff] }
   0x3   :  { %v22_v5 = vld [vmem:[%s266_s2 + $0x10] sm:$0xff]  ;;  %139 = vmatpush.msra.mxu2 %v65_v3  ;;  %81 = vmatpush.msra.mxu1 %v65_v3 }
   0x4   :  { %134 = vmatpush.msra.mxu3 %v24_v1  ;;  %44 = vmatpush.msra.mxu0 %v24_v1 }
   0x5   :  { %9 = vsyncpa [#allocation3], 0  ;;  %v63_v6 = vld [vmem:[%s267_s3 + $0x28] sm:$0xff]  ;;  %140 = vmatpush.msra.mxu2 %v64_v4  ;;  %82 = vmatpush.msra.mxu1 %v64_v4  ;;  %v62_v8 = vld [vmem:[%s267_s3 + $0x20] sm:$0xff]  ;;  %vm26_vm0 = vcmask 392192   ;;  %vm66_vm1 = vcmask 523264  }
   0x6   :  { %135 = vmatpush.msra.mxu3 %v23_v2  ;;  %45 = vmatpush.msra.mxu0 %v23_v2  ;;  %v21_v7 = vld [vmem:[%s266_s2 + $0x8] sm:$0xff]  ;;  %v20_v9 = vld [vmem:[%s266_s2] sm:$0xff]  ;;  %v61_v12 = vld [vmem:[%s267_s3 + $0x18] sm:$0xff]  ;;  %s117_s24 = sshll.u32 %s268_s4, 4  ;;  %s178_s25 = smov 8   ;;  %s118_s24 = int_to_ptr.hbm [resolvable:$true] %s117_s24 }
   0x7   :  { %141 = vmatpush.msra.mxu2 %v63_v6  ;;  %83 = vmatpush.msra.mxu1 %v63_v6  ;;  %v19_v10 = vld [vmem:[%s265_s1 + $0x8] sm:$0xff]  ;;  %v18_v11 = vld [vmem:[%s265_s1] sm:$0xff]  ;;  %v60_v13 = vld [vmem:[%s267_s3 + $0x10] sm:$0xff] }
   0x8   :  { %136 = vmatpush.msra.mxu3 %v22_v5  ;;  %46 = vmatpush.msra.mxu0 %v22_v5  ;;  %v59_v14 = vld [vmem:[%s267_s3 + $0x8] sm:$0xff]  ;;  %v58_v15 = vld [vmem:[%s267_s3] sm:$0xff]  ;;  %s176_s3 = smov [#allocation2]  }
   0x9   :  { %142 = vmatpush.msra.mxu2 %v62_v8  ;;  %84 = vmatpush.msra.mxu1 %v62_v8  ;;  %v96_v20 = vld [vmem:[%s264_s0] sm:$0x3]  ;;  %s115_s21 = sshll.u32 %s176_s3, 4  ;;  %s177_s0 = smov 128   ;;  %s116_s21 = int_to_ptr.vmem [resolvable:$true] %s115_s21 }
   0xa   :  { %137 = vmatpush.msra.mxu3 %v21_v7  ;;  %47 = vmatpush.msra.mxu0 %v21_v7  ;;  %v98_v21 = vrot.slane %v96_v20, 1  ;;  %v99_v22 = vperm.slane %v96_v20, 0 }
   0xb   :  { %143 = vmatpush.msra.mxu2 %v61_v12  ;;  %85 = vmatpush.msra.mxu1 %v61_v12 }
   0xc   :  { %138 = vmatpush.msra.mxu3 %v20_v9  ;;  %48 = vmatpush.msra.mxu0 %v20_v9  ;;  %v100_v23 = vperm.slane %v98_v21, 0 }
   0xd   :  { %130 = vmatmul.msk.f32.vlgmr.msra.gmra.mxu3 %vm26_vm0, %v19_v10  ;;  %129 = vmatmul.msk.f32.vlgmr.msra.gmra.mxu0 %vm26_vm0, %v18_v11 }
   0xe   :  { %144 = vmatpush.msra.mxu2 %v60_v13  ;;  %86 = vmatpush.msra.mxu1 %v60_v13 }
  0x10   :  { %145 = vmatpush.msra.mxu2 %v59_v14  ;;  %87 = vmatpush.msra.mxu1 %v59_v14 }
  0x12   :  { %146 = vmatpush.msra.mxu2 %v58_v15  ;;  %88 = vmatpush.msra.mxu1 %v58_v15 }
  0x8a   :  { %v50_v16 = vpop.f32.mrf.mxu0 }
  0x8b   :  { %v56_v17 = vmax.f32 %v50_v16, 0.0 }
  0x8d   :  { %131 = vmatmul.msk.f32.vlgmr.msra.gmra.mxu1 %vm66_vm1, %v56_v17 }
  0x90   :  { %v53_v18 = vpop.f32.mrf.mxu3 }
  0x91   :  { %v57_v19 = vmax.f32 %v53_v18, 0.0 }
  0x93   :  { %132 = vmatmul.msk.f32.vlgmr.msra.gmra.mxu2 %vm66_vm1, %v57_v19 }
 0x10a   :  { %v90_v24 = vpop.f32.mrf.mxu1 }
 0x10b   :  { %v103_v25 = vadd.f32 %v99_v22, %v90_v24  ;;  %v105_v26 = vadd.f32 %v100_v23, %v90_v24 }
 0x10d   :  { %107 = vst.msk [vmem:[#allocation2] sm:$0xff] %vm26_vm0, %v103_v25 }
 0x10e   :  { %109 = vst.msk [vmem:[#allocation2 + $0x10] sm:$0xff] %vm26_vm0, %v105_v26 }
 0x116   :  { %v93_v27 = vpop.f32.mrf.mxu2 }
 0x117   :  { %v104_v28 = vadd.f32 %v99_v22, %v93_v27  ;;  %v106_v29 = vadd.f32 %v100_v23, %v93_v27 }
 0x119   :  { %108 = vst.msk [vmem:[#allocation2 + $0x8] sm:$0xff] %vm26_vm0, %v104_v28 }
 0x11a   :  { %110 = vst.msk [vmem:[#allocation2 + $0x18] sm:$0xff] %vm26_vm0, %v106_v29 }
 0x11b   :  { %123 = dma.vmem_to_hbm [thread:$0]  %s116_s21, 512, %s118_s24, [#allocation3], %s177_s0, %s177_s0, %s178_s25  }
 0x11c   :  { %174 = dma.done.wait [#allocation3], 512  }
 0x11d   :  { %175 = vsyncadd [#allocation3], 4294966784 }
 0x11e   :  { %128 = vsyncpa [#allocation3], 1 }

</bundles_post_ra>
